<compile_context>
chip_gen: v7x
topology: tpu7x:2x2x1
jax: 0.10.0
libtpu: 0.0.40
codegen_flags: <defaults>
</compile_context>

<pallas_src>
import jax
import jax.numpy as jnp
from jax import lax
from jax.experimental import pallas as pl
from jax.experimental.pallas import tpu as pltpu

BN_EPS = 1e-5
LANE = 128


def _round_up(x, n):
    return ((x + n - 1) // n) * n


# ---------------------------------------------------------------------------
# Pass 1: conv tile (MXU GEMM) + per-tile partial BN statistics
# ---------------------------------------------------------------------------
def _conv_stats_kernel(p_ref, w_ref, h_ref, stats_ref):
    # p_ref     : [TM, K_pad]    bf16 im2col patch tile
    # w_ref     : [K_pad, C_pad] bf16 conv weight (same block every grid step)
    # h_ref     : [TM, C_pad]    f32 pre-BN conv output tile
    # stats_ref : [1, 2, C_pad]  f32 per-tile partials (row 0 = sum, row 1 = sumsq)
    h = jnp.dot(p_ref[...], w_ref[...], preferred_element_type=jnp.float32)
    h_ref[...] = h.astype(h_ref.dtype)
    s = jnp.sum(h, axis=0, keepdims=True)          # [1, C_pad]
    ss = jnp.sum(h * h, axis=0, keepdims=True)     # [1, C_pad]
    stats_ref[0] = jnp.concatenate([s, ss], axis=0)


# ---------------------------------------------------------------------------
# Pass 2: apply fused BN scale/shift + ReLU (one FMA + max per element)
# ---------------------------------------------------------------------------
def _bn_relu_kernel(h_ref, ss_ref, o_ref):
    # h_ref  : [TM, C_pad] f32 conv output tile
    # ss_ref : [2, C_pad]  f32 (row 0 = scale, row 1 = shift)
    # o_ref  : [TM, C_pad] f32 lane-dense output tile
    scale = ss_ref[0:1, :]
    shift = ss_ref[1:2, :]
    o_ref[...] = jnp.maximum(h_ref[...] * scale + shift, 0.0).astype(o_ref.dtype)


# ---------------------------------------------------------------------------
# Wrapper (layout plumbing only; all compute is inside the pallas_calls)
# ---------------------------------------------------------------------------
def _im2col(x_nhwc, kh, kw, stride, padding):
    """[N,H,W,Cin] -> [N*H_out*W_out, KH*KW*Cin] (pure XLA layout plumbing)."""
    n, h, w, cin = x_nhwc.shape
    xp = jnp.pad(x_nhwc, ((0, 0), (padding, padding), (padding, padding), (0, 0)))
    h_out = (h + 2 * padding - kh) // stride + 1
    w_out = (w + 2 * padding - kw) // stride + 1
    cols = []
    for ky in range(kh):
        for kx in range(kw):
            cols.append(
                xp[:, ky:ky + h_out * stride:stride, kx:kx + w_out * stride:stride, :]
            )
    patches = jnp.concatenate(cols, axis=-1)       # [N, H_out, W_out, KH*KW*Cin]
    return patches.reshape(n * h_out * w_out, kh * kw * cin), h_out, w_out


def conv_bn_relu(x, weight, gamma, beta, *, stride=1, padding=1, tm=256):
    """x: [N, C_in, H, W] f32; weight: [C_out, C_in, KH, KW]; gamma/beta: [C_out].
    Returns [N, C_out, H_out, W_out] f32 with train-mode BN semantics."""
    n, cin, h, w = x.shape
    cout, cin_w, kh, kw = weight.shape
    assert cin == cin_w

    c_pad = _round_up(max(cout, LANE), LANE)

    # TODO(synk): build the 3x3 patches inside the kernel (9 shifted taps over a
    # halo'd activation tile) to eliminate the ~9x im2col HBM inflation; kept in
    # the wrapper here as layout plumbing.
    x_nhwc = jnp.transpose(x, (0, 2, 3, 1))
    patches, h_out, w_out = _im2col(x_nhwc, kh, kw, stride, padding)
    m, k = patches.shape
    k_pad = _round_up(max(k, LANE), LANE)

    tm = min(tm, _round_up(m, 8))
    m_pad = _round_up(m, tm)
    num_tiles = m_pad // tm

    # Zero-padded M rows contribute 0 to both sums; zero-padded K columns add 0 to
    # the dot.  Matmul operands in bf16 (MXU-native), accumulation in f32.
    patches = jnp.pad(patches, ((0, m_pad - m), (0, k_pad - k))).astype(jnp.bfloat16)
    w_mat = jnp.transpose(weight, (2, 3, 1, 0)).reshape(k, cout)
    w_mat = jnp.pad(w_mat, ((0, k_pad - k), (0, c_pad - cout))).astype(jnp.bfloat16)

    params = pltpu.CompilerParams(
        dimension_semantics=("parallel",),
        vmem_limit_bytes=64 * 1024 * 1024,
    )

    # ---- Pass 1: conv tiles + per-tile partial BN statistics ----
    conv_flops = 2 * m_pad * k_pad * c_pad + 3 * m_pad * c_pad
    conv_bytes = 2 * (m_pad * k_pad + k_pad * c_pad) + 4 * (m_pad + 2 * num_tiles) * c_pad
    h_conv, partials = pl.pallas_call(
        _conv_stats_kernel,
        grid=(num_tiles,),
        in_specs=[
            pl.BlockSpec((tm, k_pad), lambda i: (i, 0)),
            pl.BlockSpec((k_pad, c_pad), lambda i: (0, 0)),
        ],
        out_specs=[
            pl.BlockSpec((tm, c_pad), lambda i: (i, 0)),
            pl.BlockSpec((1, 2, c_pad), lambda i: (i, 0, 0)),
        ],
        out_shape=[
            jax.ShapeDtypeStruct((m_pad, c_pad), jnp.float32),
            jax.ShapeDtypeStruct((num_tiles, 2, c_pad), jnp.float32),
        ],
        compiler_params=params,
        cost_estimate=pl.CostEstimate(
            flops=conv_flops, transcendentals=0, bytes_accessed=conv_bytes),
    )(patches, w_mat)

    # ---- Tiny XLA combine: fold train-mode BN into a single scale/shift ----
    totals = jnp.sum(partials, axis=0)                     # [2, C_pad]
    inv_m = 1.0 / float(m)                                 # divide by REAL row count
    mean = totals[0] * inv_m
    var = jnp.maximum(totals[1] * inv_m - mean * mean, 0.0)
    gamma_pad = jnp.pad(gamma.astype(jnp.float32), (0, c_pad - cout),
                        constant_values=1.0)
    beta_pad = jnp.pad(beta.astype(jnp.float32), (0, c_pad - cout))
    scale = gamma_pad * lax.rsqrt(var + BN_EPS)
    shift = beta_pad - mean * scale
    scale_shift = jnp.stack([scale, shift], axis=0)        # [2, C_pad]

    # ---- Pass 2: per-tile FMA + ReLU epilogue ----
    ep_flops = 3 * m_pad * c_pad
    ep_bytes = 4 * (2 * m_pad * c_pad + 2 * c_pad)
    out2d = pl.pallas_call(
        _bn_relu_kernel,
        grid=(num_tiles,),
        in_specs=[
            pl.BlockSpec((tm, c_pad), lambda i: (i, 0)),
            pl.BlockSpec((2, c_pad), lambda i: (0, 0)),
        ],
        out_specs=pl.BlockSpec((tm, c_pad), lambda i: (i, 0)),
        out_shape=jax.ShapeDtypeStruct((m_pad, c_pad), jnp.float32),
        compiler_params=params,
        cost_estimate=pl.CostEstimate(
            flops=ep_flops, transcendentals=0, bytes_accessed=ep_bytes),
    )(h_conv, scale_shift)

    # [M_pad, C_pad] -> [N, H_out, W_out, C_out] -> NCHW (drop row/lane padding).
    out = out2d[:m, :cout].reshape(n, h_out, w_out, cout)
    return jnp.transpose(out, (0, 3, 1, 2))

    # TODO(synk): BN running_mean/running_var momentum update (training-time side
    # effect of nn.BatchNorm2d) is not produced as an output here.


def reference(x, weight, gamma, beta, *, stride=1, padding=1):
    y = lax.conv_general_dilated(
        x, weight, window_strides=(stride, stride),
        padding=((padding, padding), (padding, padding)),
        dimension_numbers=("NCHW", "OIHW", "NCHW"),
    )
    mean = y.mean(axis=(0, 2, 3), keepdims=True)
    var = ((y - mean) ** 2).mean(axis=(0, 2, 3), keepdims=True)
    yn = (y - mean) / jnp.sqrt(var + BN_EPS)
    yn = yn * gamma.reshape(1, -1, 1, 1) + beta.reshape(1, -1, 1, 1)
    return jnp.maximum(yn, 0.0)


if __name__ == "__main__":
    key = jax.random.PRNGKey(0)
    kx, kw_ = jax.random.split(key)

    # Small shapes consistent with the module's forward.
    N, C_IN, H, W = 2, 4, 16, 16
    C_OUT, KS = 8, 3

    x = jax.random.normal(kx, (N, C_IN, H, W), jnp.float32)
    # Kaiming-normal (fan_out, relu) like the module init; gamma=1, beta=0.
    fan_out = C_OUT * KS * KS
    weight = jax.random.normal(kw_, (C_OUT, C_IN, KS, KS), jnp.float32) * jnp.sqrt(2.0 / fan_out)
    gamma = jnp.ones((C_OUT,), jnp.float32)
    beta = jnp.zeros((C_OUT,), jnp.float32)

    out = conv_bn_relu(x, weight, gamma, beta)
    out = jax.block_until_ready(out)

    ref = reference(x, weight, gamma, beta)
    assert out.shape == (N, C_OUT, H, W), out.shape
    # bf16 matmul operands -> tolerance relaxed vs the pure-f32 reference.
    assert jnp.allclose(out, ref, atol=5e-2, rtol=5e-2), float(jnp.abs(out - ref).max())

    print("KERNEL_OK")
</pallas_src>

<mosaic_0001>
module attributes {stable_mosaic.version = 11 : i64} {
  func.func @_conv_stats_kernel(%arg0: i32, %arg1: memref<256x128xbf16, #tpu.memory_space<vmem>>, %arg2: memref<128x128xbf16, #tpu.memory_space<vmem>>, %arg3: memref<256x128xf32, #tpu.memory_space<vmem>>, %arg4: memref<1x2x128xf32, #tpu.memory_space<vmem>>) attributes {dimension_semantics = [#tpu.dimension_semantics<parallel>], iteration_bounds = array<i64: 2>, scalar_prefetch = 0 : i64, scratch_operands = 0 : i64, tpu.core_type = #tpu.core_type<tc>, window_params = [{transform_indices = @transform_0, window_bounds = array<i64: 256, 128>}, {pipeline_mode = #tpu.pipeline_mode<synchronous>, transform_indices = @transform_1, window_bounds = array<i64: 128, 128>}, {transform_indices = @transform_2, window_bounds = array<i64: 256, 128>}, {transform_indices = @transform_3, window_bounds = array<i64: 1, 2, 128>}]} {
    %c0 = arith.constant 0 : index
    %c0_0 = arith.constant 0 : index
    %0 = vector.load %arg1[%c0, %c0_0] : memref<256x128xbf16, #tpu.memory_space<vmem>>, vector<256x128xbf16>
    %c0_1 = arith.constant 0 : index
    %c0_2 = arith.constant 0 : index
    %1 = vector.load %arg2[%c0_1, %c0_2] : memref<128x128xbf16, #tpu.memory_space<vmem>>, vector<128x128xbf16>
    %cst = arith.constant dense<0.000000e+00> : vector<256x128xf32>
    %2 = tpu.matmul %0, %1, %cst {dimension_numbers = #tpu.dot_dimension_numbers<[1], [0], [0], [1], [0, 0, 1, 1], [], []>} : vector<256x128xbf16>, vector<128x128xbf16>, vector<256x128xf32> -> vector<256x128xf32>
    %c0_3 = arith.constant 0 : index
    %c0_4 = arith.constant 0 : index
    %3 = vector.load %arg3[%c0_3, %c0_4] : memref<256x128xf32, #tpu.memory_space<vmem>>, vector<256x128xf32>
    tpu.vector_store %arg3[%c0_3, %c0_4], %2 {strides = array<i32>} : memref<256x128xf32, #tpu.memory_space<vmem>>, vector<256x128xf32>,
    %cst_5 = arith.constant dense<0.000000e+00> : vector<128xf32>
    %4 = vector.multi_reduction <add>, %2, %cst_5 [0] : vector<256x128xf32> to vector<128xf32>
    %5 = vector.shape_cast %4 : vector<128xf32> to vector<1x128xf32>
    %6 = arith.mulf %2, %2 : vector<256x128xf32>
    %cst_6 = arith.constant dense<0.000000e+00> : vector<128xf32>
    %7 = vector.multi_reduction <add>, %6, %cst_6 [0] : vector<256x128xf32> to vector<128xf32>
    %8 = vector.shape_cast %7 : vector<128xf32> to vector<1x128xf32>
    %9 = tpu.concatenate %5, %8 in 0 : vector<1x128xf32>, vector<1x128xf32> -> vector<2x128xf32>
    %c0_7 = arith.constant 0 : index
    %c0_8 = arith.constant 0 : index
    %c0_9 = arith.constant 0 : index
    %10 = vector.load %arg4[%c0_7, %c0_8, %c0_9] : memref<1x2x128xf32, #tpu.memory_space<vmem>>, vector<1x2x128xf32>
    %11 = vector.shape_cast %10 : vector<1x2x128xf32> to vector<2x128xf32>
    %12 = vector.shape_cast %9 : vector<2x128xf32> to vector<1x2x128xf32>
    tpu.vector_store %arg4[%c0_7, %c0_8, %c0_9], %12 {strides = array<i32>} : memref<1x2x128xf32, #tpu.memory_space<vmem>>, vector<1x2x128xf32>,
    return
  }
  func.func @transform_0(%arg0: i32) -> (i32, i32) {
    %c0_i32 = arith.constant 0 : i32
    %c0_i32_0 = arith.constant 0 : i32
    return %arg0, %c0_i32 : i32, i32
  }
  func.func @transform_1(%arg0: i32) -> (i32, i32) {
    %c0_i32 = arith.constant 0 : i32
    %c0_i32_0 = arith.constant 0 : i32
    %c0_i32_1 = arith.constant 0 : i32
    return %c0_i32, %c0_i32_0 : i32, i32
  }
  func.func @transform_2(%arg0: i32) -> (i32, i32) {
    %c0_i32 = arith.constant 0 : i32
    %c0_i32_0 = arith.constant 0 : i32
    return %arg0, %c0_i32 : i32, i32
  }
  func.func @transform_3(%arg0: i32) -> (i32, i32, i32) {
    %c0_i32 = arith.constant 0 : i32
    %c0_i32_0 = arith.constant 0 : i32
    %c0_i32_1 = arith.constant 0 : i32
    return %arg0, %c0_i32, %c0_i32_0 : i32, i32, i32
  }
}

</mosaic_0001>

<bundles_post_ra>
// kernel: tpu_custom_call.1
= control target key start
LH: loop header
LB: loop body
LE: loop exit
PB: predicated region body
PF: predicated region fallthrough
CT: control target
= control target key end

     0   :  { %9 = vsyncpa [#allocation3], 0  ;;  %s1660_s0 = inlined_call_operand.hbm [shape: bf16[512,128], index: 0, kind: input, shape index: {}]   ;;  %s1661_s1 = inlined_call_operand.hbm [shape: bf16[128,128], index: 1, kind: input, shape index: {}]   ;;  %s1662_s2 = inlined_call_operand.hbm [shape: f32[512,128], index: 2, kind: output, shape index: {0}]   ;;  %s1663_s3 = inlined_call_operand.hbm [shape: f32[2,2,128], index: 3, kind: output, shape index: {1}]  }
   0x1   :  { %11 = vsyncpa [#allocation3 + $0x1], 0 }
   0x2   :  { %12 = vsyncpa [#allocation6], 0 }
   0x3   :  { %13 = vsyncpa [#allocation4], 0 }
   0x4   :  { %15 = vsyncpa [#allocation4 + $0x1], 0 }
   0x5   :  { %16 = vsyncpa [#allocation9], 0 }
   0x6   :  { %18 = vsyncpa [#allocation9 + $0x1], 0  ;;  %s1272_s12 = smov 0   ;;  %s1274_s13 = smov 0  }
   0x7   :  { %s1276_s14 = smov 0   ;;  %s1278_s15 = smov 0  }
   0x8 LB: > { %s1293_s16 = sadd.s32 4294967295, %s1242_s15   ;;  %s859_s17 = sadd.s32 4294967294, %s1242_s15   ;;  %s1242_s15 = sphi %s1278_s15, %s1683_s15   ;;  %s1238_s14 = sphi %s1276_s14, %s1682_s14   ;;  %s1234_s13 = sphi %s1274_s13, %s1681_s13   ;;  %s1230_s12 = sphi %s1272_s12, %s1680_s12  }
   0x9   : > { %p44_p0 = scmp.ne.s32.totalorder %s1234_s13, %s1230_s12  ;;  %p1664_p1 = scmp.eq.s32.totalorder %s1293_s16, 0 }
   0xa   : > { %p95_p3 = scmp.eq.s32.totalorder %s859_s17, 1  ;;  %p860_p5 = scmp.ge.s32.totalorder %s1242_s15, 1 }
   0xb   : > { %p1302_p4 = por %p1664_p1, %p44_p0  ;;  %p128_p7 = scmp.lt.s32.totalorder %s1242_s15, 3 }
   0xc   : > { %p1307_p6 = por %p95_p3, %p44_p0  ;;  %s1244_s21 = smov [#allocation5]  }
   0xd   : > { %s1667_s18 = scalar_select %p1302_p4, 1, 0 }
   0xe   : > { %s1668_s19 = scalar_select %p1307_p6, 1, 0 }
   0xf   : > { %p1312_p8 = pnand %p860_p5, %p128_p7  ;;  %s140_s22 = sshll.u32 %s1244_s21, 4  ;;  %s1316_s22 = int_to_ptr.vmem [resolvable:$true] %s140_s22 }
  0x10   : > { %s1328_s24 = sadd.s32 1, %s1242_s15   ;;  %s31_s25 = sadd.s32 1, %s1238_s14 }
  0x11   : > { %s1669_s20 = scalar_select %p1312_p8, 1, 0 }
  0x12   : > { %p1002_p9 = pneg %p1312_p8  ;;  %s28_s26 = ssub.s32 %s1242_s15, %s1328_s24 }
  0x13   : > { %s1082_s29 = scalar_lea.hbm %s1661_s1, 1024 }
  0x14   : > { %p1323_p11 = pnand %p1002_p9, %p1664_p1  ;;  %p1083_p12 = scmp.ne.s32.totalorder %s1661_s1, %s1082_s29 }
  0x15   : > { %p1089_p5 = scmp.lt.u32.totalorder %s1082_s29, %s1661_s1 }
  0x16   : > { %p1084_p13 = pneg %p1323_p11 }
  0x18   : > { %p1085_p0 = pnand %p1084_p13, %p1083_p12 }
  0x1a   : > { %p1086_p3 = pneg %p1085_p0 }
  0x1c   : > { %p1091_p7 = pnand %p1089_p5, %p1086_p3 }
  0x1e   : > { %1094 = shalt.err (!%p1091_p7)
}
  0x1f   : > { %s1095_s7 = scalar_lea.vmem %s1316_s22, 1024  ;;  %p1103_p2 = scmp.lt.s32.totalorder %s1316_s22, %s1316_s22 }
  0x20   : > { %p1096_p9 = scmp.ne.s32.totalorder %s1316_s22, %s1095_s7  ;;  %p1104_p6 = scmp.lt.s32.totalorder %s1095_s7, %s1095_s7 }
  0x22   : > { %p1098_p10 = pnand %p1096_p9, %p1084_p13  ;;  %p1105_p4 = por %p1104_p6, %p1103_p2 }
  0x24   : > { %p1099_p1 = pneg %p1098_p10 }
  0x26   : > { %p1106_p8 = pnand %p1105_p4, %p1099_p1 }
  0x28   : > { %1109 = shalt.err (!%p1106_p8)
}
  0x29   : > { %s1245_s8 = smov 64   ;;  %s1246_s9 = smov 4  }
  0x2a   : > { %1005 = dma.hbm_to_vmem [thread:$0]  (!%p1323_p11), %s1661_s1, 1024, %s1316_s22, [#allocation6], %s1245_s8, %s1245_s8, %s1246_s9  }
  0x2b   : > { %p29_p1 = scmp.eq.s32.totalorder %s28_s26, 0  ;;  %p38_p2 = scmp.ne.s32.totalorder %s1238_s14, %s1234_s13 }
  0x2c   : > { %p39_p4 = scmp.eq.s32.totalorder %s1242_s15, 0  ;;  %p1018_p6 = scmp.lt.s32.totalorder %s1242_s15, 2 }
  0x2d   : > { %s1362_s17 = scalar_select %p29_p1, %s1238_s14, %s31_s25  }
  0x2e   : > { %p40_p8 = por %p39_p4, %p38_p2  ;;  %p1671_p10 = scmp.eq.s32.totalorder %s1293_s16, 1 }
  0x2f   : > { %s154_s23 = sand.u32 1, %s1238_s14   ;;  %s902_s27 = sshll.u32 %s1242_s15, 11 }
  0x30   : > { %p1366_p12 = por %p1671_p10, %p38_p2  ;;  %s863_s28 = sshll.u32 %s154_s23, 7 }
  0x31   : > { %s1375_s4 = scalar_lea.hbm %s1660_s0, %s902_s27  ;;  %s158_s22 = scalar_lea.vmem [#allocation2], %s863_s28 }
  0x32   : > { %s165_s25 = sshll.u32 %s158_s22, 4  ;;  %p1377_p11 = pnand %p1018_p6, %p40_p8  ;;  %s1381_s25 = int_to_ptr.vmem [resolvable:$true] %s165_s25 }
  0x33   : > { %s1383_s5 = scalar_lea.sflag [#allocation3], %s154_s23  ;;  %s1110_s6 = scalar_lea.hbm %s1375_s4, 2048 }
  0x34   : > { %p1111_p13 = scmp.ne.s32.totalorder %s1375_s4, %s1110_s6  ;;  %p1112_p0 = pneg %p1377_p11 }
  0x35   : > { %s1115_s11 = scalar_lea.hbm %s1660_s0, 4096  ;;  %p1116_p7 = scmp.lt.u32.totalorder %s1375_s4, %s1660_s0 }
  0x36   : > { %p1113_p3 = pnand %p1112_p0, %p1111_p13  ;;  %p1117_p9 = scmp.lt.u32.totalorder %s1115_s11, %s1110_s6 }
  0x37   : > { %p1119_p2 = scmp.lt.u32.totalorder %s1110_s6, %s1375_s4 }
  0x38   : > { %p1114_p5 = pneg %p1113_p3  ;;  %p1118_p1 = por %p1117_p9, %p1116_p7 }
  0x3a   : > { %p1120_p4 = por %p1119_p2, %p1118_p1 }
  0x3c   : > { %p1121_p6 = pnand %p1120_p4, %p1114_p5 }
  0x3e   : > { %1124 = shalt.err (!%p1121_p6)
}
  0x3f   : > { %s1125_s23 = scalar_lea.vmem %s1381_s25, 2048  ;;  %s1247_s29 = smov [#allocation2]  }
  0x40   : > { %p1126_p8 = scmp.ne.s32.totalorder %s1381_s25, %s1125_s23  ;;  %s1130_s30 = sshll.u32 %s1247_s29, 4  ;;  %s1131_s30 = int_to_ptr.vmem [resolvable:$false] %s1130_s30 }
  0x41   : > { %s1132_s22 = scalar_lea.vmem %s1131_s30, 4096  ;;  %p1133_p3 = scmp.lt.s32.totalorder %s1381_s25, %s1131_s30 }
  0x42   : > { %p1128_p10 = pnand %p1126_p8, %p1112_p0  ;;  %p1134_p7 = scmp.lt.s32.totalorder %s1132_s22, %s1125_s23 }
  0x44   : > { %p1129_p13 = pneg %p1128_p10  ;;  %p1135_p9 = por %p1134_p7, %p1133_p3 }
  0x46   : > { %p1136_p1 = pnand %p1135_p9, %p1129_p13 }
  0x48   : > { %1139 = shalt.err (!%p1136_p1)
}
  0x49   : > { %1009 = dma.hbm_to_vmem [thread:$0]  (!%p1377_p11), %s1375_s4, 2048, %s1381_s25, %s1383_s5, %s1245_s8, %s1245_s8, %s1246_s9  }
  0x4a   : > { %p1674_p0 = scmp.ne.s32.totalorder %s1669_s20, 0 }
  0x4b   : > { %s1417_s6 = sand.u32 (!%p1674_p0), 1, %s1234_s13   ;;  %p1675_p5 = scmp.ne.s32.totalorder (!%p1674_p0), %s1667_s18, 0 }
  0x4c   : > { %177 = sbr.rel (%p1674_p0) target bundleno = 437 (0x1b5), region = 28  ;;  %s867_s7 = sshll.u32 (!%p1674_p0), %s1417_s6, 7 }
  0x4d   : > { %s180_s10 = scalar_lea.sflag (!%p1674_p0), [#allocation3], %s1417_s6  ;;  %s1421_s11 = scalar_lea.vmem (!%p1674_p0), [#allocation2], %s867_s7 }
  0x53   : > { %1213 = dma.done.wait (%p1675_p5), %s180_s10, 2048  }
  0x54   : > { %1215 = vsyncadd (%p1675_p5), %s180_s10, 4294965248  ;;  %p1676_p11 = scmp.eq.s32.totalorder %s1293_s16, 0 }
  0x56   : > { %1217 = dma.done.wait (%p1676_p11), [#allocation6], 1024   ;;  %p1677_p2 = pmov %p1676_p11 }
  0x57   : > { %v1058_v0 = vld [vmem:[#allocation5] sm:$0xff]   ;;  %v1059_v1 = vld [vmem:[#allocation5 + $0x8] sm:$0xff]   ;;  %v1060_v2 = vld [vmem:[#allocation5 + $0x10] sm:$0xff]   ;;  %s869_s18 = sshll.u32 %s1417_s6, 8  ;;  %s903_s8 = sshll.u32 %s1293_s16, 12 }
  0x58   : > { %1219 = vsyncadd (%p1677_p2), [#allocation6], 4294966272  ;;  %928 = vmatprep.subr.bf16.mxu0 %v1058_v0  ;;  %976 = vmatprep.subr.bf16.mxu1 %v1058_v0  ;;  %v1061_v3 = vld [vmem:[#allocation5 + $0x18] sm:$0xff]   ;;  %v1066_v4 = vld [vmem:[%s1421_s11] sm:$0xff]   ;;  %s1450_s20 = scalar_lea.vmem [#allocation7], %s869_s18  ;;  %s1522_s26 = scalar_lea.hbm %s1662_s2, %s903_s8 }
  0x59   : > { %929 = vmatpush3.bf16.msra.mxu0 %v1058_v0  ;;  %984 = vmatpush3.bf16.msra.mxu1 %v1058_v0  ;;  %v1062_v5 = vld [vmem:[#allocation5 + $0x20] sm:$0xff]   ;;  %v1063_v6 = vld [vmem:[#allocation5 + $0x28] sm:$0xff]   ;;  %v1064_v8 = vld [vmem:[#allocation5 + $0x30] sm:$0xff]   ;;  %s731_s9 = sshll.u32 %s1450_s20, 4  ;;  %s713_s5 = scalar_lea.sflag [#allocation4], %s1417_s6  ;;  %s1524_s9 = int_to_ptr.vmem [resolvable:$true] %s731_s9 }
  0x5a   : > { %930 = vmatprep.subr.bf16.mxu0 %v1059_v1  ;;  %977 = vmatprep.subr.bf16.mxu1 %v1059_v1  ;;  %v1074_v7 = vld [vmem:[%s1421_s11 + $0x40] sm:$0xff]   ;;  %v1065_v9 = vld [vmem:[#allocation5 + $0x38] sm:$0xff]   ;;  %v1067_v10 = vld [vmem:[%s1421_s11 + $0x8] sm:$0xff]   ;;  %s1140_s27 = scalar_lea.vmem %s1524_s9, 4096  ;;  %s1248_s28 = smov [#allocation7]  }
  0x5b   : > { %944 = vmatprep.mubr.bf16.mxu0 %v1066_v4  ;;  %960 = vmatprep.mubr.bf16.mxu1 %v1074_v7  ;;  %v1075_v11 = vld [vmem:[%s1421_s11 + $0x48] sm:$0xff]   ;;  %v1068_v12 = vld [vmem:[%s1421_s11 + $0x10] sm:$0xff]   ;;  %v1069_v14 = vld [vmem:[%s1421_s11 + $0x18] sm:$0xff]   ;;  %p1141_p4 = scmp.ne.s32.totalorder %s1524_s9, %s1140_s27  ;;  %s1144_s23 = sshll.u32 %s1248_s28, 4  ;;  %s1145_s23 = int_to_ptr.vmem [resolvable:$false] %s1144_s23 }
  0x5c   : > { %v1076_v13 = vld [vmem:[%s1421_s11 + $0x50] sm:$0xff]   ;;  %v1077_v15 = vld [vmem:[%s1421_s11 + $0x58] sm:$0xff]   ;;  %v1070_v16 = vld [vmem:[%s1421_s11 + $0x20] sm:$0xff]   ;;  %s1146_s29 = scalar_lea.vmem %s1145_s23, 8192  ;;  %p1147_p10 = scmp.lt.s32.totalorder %s1524_s9, %s1145_s23 }
  0x5d   : > { %931 = vmatpush3.bf16.msra.mxu0 %v1059_v1  ;;  %985 = vmatpush3.bf16.msra.mxu1 %v1059_v1  ;;  %v1078_v17 = vld [vmem:[%s1421_s11 + $0x60] sm:$0xff]   ;;  %v1071_v18 = vld [vmem:[%s1421_s11 + $0x28] sm:$0xff]   ;;  %v1072_v20 = vld [vmem:[%s1421_s11 + $0x30] sm:$0xff]   ;;  %p1142_p6 = pnand %p1141_p4, %p1366_p12  ;;  %p1148_p13 = scmp.lt.s32.totalorder %s1146_s29, %s1140_s27 }
  0x5e   : > { %932 = vmatprep.subr.bf16.mxu0 %v1060_v2  ;;  %978 = vmatprep.subr.bf16.mxu1 %v1060_v2  ;;  %v1079_v19 = vld [vmem:[%s1421_s11 + $0x68] sm:$0xff]   ;;  %v1080_v21 = vld [vmem:[%s1421_s11 + $0x70] sm:$0xff]   ;;  %v1073_v22 = vld [vmem:[%s1421_s11 + $0x38] sm:$0xff]  }
  0x5f   : > { %v1081_v23 = vld [vmem:[%s1421_s11 + $0x78] sm:$0xff]   ;;  %p1143_p8 = pneg %p1142_p6  ;;  %p1149_p3 = por %p1148_p13, %p1147_p10 }
  0x61   : > { %933 = vmatpush3.bf16.msra.mxu0 %v1060_v2  ;;  %986 = vmatpush3.bf16.msra.mxu1 %v1060_v2  ;;  %p1150_p7 = pnand %p1149_p3, %p1143_p8 }
  0x62   : > { %934 = vmatprep.subr.bf16.mxu0 %v1061_v3  ;;  %979 = vmatprep.subr.bf16.mxu1 %v1061_v3 }
  0x65   : > { %935 = vmatpush3.bf16.msra.mxu0 %v1061_v3  ;;  %987 = vmatpush3.bf16.msra.mxu1 %v1061_v3 }
  0x66   : > { %936 = vmatprep.subr.bf16.mxu0 %v1062_v5  ;;  %980 = vmatprep.subr.bf16.mxu1 %v1062_v5 }
  0x69   : > { %937 = vmatpush3.bf16.msra.mxu0 %v1062_v5  ;;  %988 = vmatpush3.bf16.msra.mxu1 %v1062_v5 }
  0x6a   : > { %938 = vmatprep.subr.bf16.mxu0 %v1063_v6  ;;  %981 = vmatprep.subr.bf16.mxu1 %v1063_v6 }
  0x6d   : > { %939 = vmatpush3.bf16.msra.mxu0 %v1063_v6  ;;  %989 = vmatpush3.bf16.msra.mxu1 %v1063_v6 }
  0x6e   : > { %940 = vmatprep.subr.bf16.mxu0 %v1064_v8  ;;  %982 = vmatprep.subr.bf16.mxu1 %v1064_v8 }
  0x71   : > { %941 = vmatpush3.bf16.msra.mxu0 %v1064_v8  ;;  %990 = vmatpush3.bf16.msra.mxu1 %v1064_v8 }
  0x72   : > { %942 = vmatprep.subr.bf16.mxu0 %v1065_v9  ;;  %983 = vmatprep.subr.bf16.mxu1 %v1065_v9 }
  0x75   : > { %943 = vmatpush3.bf16.msra.mxu0 %v1065_v9  ;;  %991 = vmatpush3.bf16.msra.mxu1 %v1065_v9 }
  0x78   : > { %945 = vmatmul.mubr.bf16.vlgmr.msra.gmra.mrb[0].mxu0 %v1067_v10  ;;  %961 = vmatmul.mubr.bf16.vlgmr.msra.gmra.mrb[0].mxu1 %v1075_v11 }
  0x79   : > { %948 = vmatprep.mubr.bf16.mxu0 %v1068_v12  ;;  %964 = vmatprep.mubr.bf16.mxu1 %v1076_v13 }
  0x80   : > { %949 = vmatmul.mubr.bf16.gmra.mrb[4].mxu0 %v1069_v14  ;;  %965 = vmatmul.mubr.bf16.gmra.mrb[4].mxu1 %v1077_v15 }
  0x81   : > { %952 = vmatprep.mubr.bf16.mxu0 %v1070_v16  ;;  %968 = vmatprep.mubr.bf16.mxu1 %v1078_v17 }
  0x88   : > { %953 = vmatmul.mubr.bf16.gmra.mrb[8].mxu0 %v1071_v18  ;;  %969 = vmatmul.mubr.bf16.gmra.mrb[8].mxu1 %v1079_v19 }
  0x89   : > { %956 = vmatprep.mubr.bf16.mxu0 %v1072_v20  ;;  %972 = vmatprep.mubr.bf16.mxu1 %v1080_v21 }
  0x90   : > { %957 = vmatmul.mubr.bf16.gmra.mrb[12].mxu0 %v1073_v22  ;;  %973 = vmatmul.mubr.bf16.gmra.mrb[12].mxu1 %v1081_v23 }
 0x14b   : > { %v946_v24 = vpop.f32.mrb[0].mxu0  ;;  %v1448_v25 = vpop.f32.mrb[0].mxu1 }
 0x14c   : > { %573 = vst [vmem:[%s1450_s20 + $0x10] sm:$0xff] %v946_v24  ;;  %v444_v26 = vpop.f32.mrb[1].mxu0  ;;  %589 = vst [vmem:[%s1450_s20 + $0x90] sm:$0xff] %v1448_v25  ;;  %v1455_v27 = vpop.f32.mrb[1].mxu1  ;;  %v642_v35 = vmul.f32 %v946_v24, %v946_v24 }
 0x14d   : > { %571 = vst [vmem:[%s1450_s20] sm:$0xff] %v444_v26  ;;  %v947_v28 = vpop.f32.mrb[2].mxu0  ;;  %587 = vst [vmem:[%s1450_s20 + $0x80] sm:$0xff] %v1455_v27  ;;  %v1460_v29 = vpop.f32.mrb[2].mxu1  ;;  %v640_v32 = vmul.f32 %v444_v26, %v444_v26 }
 0x14e   : > { %574 = vst [vmem:[%s1450_s20 + $0x18] sm:$0xff] %v947_v28  ;;  %v447_v30 = vpop.f32.mrb[3].mxu0  ;;  %590 = vst [vmem:[%s1450_s20 + $0x98] sm:$0xff] %v1460_v29  ;;  %v1465_v31 = vpop.f32.mrb[3].mxu1  ;;  %v643_v38 = vmul.f32 %v947_v28, %v947_v28 }
 0x14f   : > { %572 = vst [vmem:[%s1450_s20 + $0x8] sm:$0xff] %v447_v30  ;;  %v603_v33 = vadd.f32 %v447_v30, %v444_v26  ;;  %v641_v34 = vmul.f32 %v447_v30, %v447_v30  ;;  %588 = vst [vmem:[%s1450_s20 + $0x88] sm:$0xff] %v1465_v31 }
 0x151   : > { %v604_v36 = vadd.f32 %v946_v24, %v603_v33  ;;  %v672_v37 = vadd.f32 %v641_v34, %v640_v32 }
 0x153   : > { %v673_v39 = vadd.f32 %v672_v37, %v642_v35  ;;  %v950_v40 = vpop.f32.mrb[4].mxu0  ;;  %v605_v41 = vadd.f32 %v947_v28, %v604_v36  ;;  %v1470_v42 = vpop.f32.mrb[4].mxu1 }
 0x154   : > { %577 = vst [vmem:[%s1450_s20 + $0x30] sm:$0xff] %v950_v40  ;;  %v460_v43 = vpop.f32.mrb[5].mxu0  ;;  %593 = vst [vmem:[%s1450_s20 + $0xb0] sm:$0xff] %v1470_v42  ;;  %v1475_v44 = vpop.f32.mrb[5].mxu1  ;;  %v646_v55 = vmul.f32 %v950_v40, %v950_v40 }
 0x155   : > { %575 = vst [vmem:[%s1450_s20 + $0x20] sm:$0xff] %v460_v43  ;;  %v606_v45 = vadd.f32 %v605_v41, %v460_v43  ;;  %v644_v46 = vmul.f32 %v460_v43, %v460_v43  ;;  %v674_v47 = vadd.f32 %v673_v39, %v643_v38  ;;  %v951_v48 = vpop.f32.mrb[6].mxu0  ;;  %591 = vst [vmem:[%s1450_s20 + $0xa0] sm:$0xff] %v1475_v44  ;;  %v1480_v49 = vpop.f32.mrb[6].mxu1 }
 0x156   : > { %578 = vst [vmem:[%s1450_s20 + $0x38] sm:$0xff] %v951_v48  ;;  %v463_v50 = vpop.f32.mrb[7].mxu0  ;;  %594 = vst [vmem:[%s1450_s20 + $0xb8] sm:$0xff] %v1480_v49  ;;  %v1485_v51 = vpop.f32.mrb[7].mxu1  ;;  %v647_v58 = vmul.f32 %v951_v48, %v951_v48 }
 0x157   : > { %v675_v52 = vadd.f32 %v674_v47, %v644_v46  ;;  %576 = vst [vmem:[%s1450_s20 + $0x28] sm:$0xff] %v463_v50  ;;  %v607_v53 = vadd.f32 %v606_v45, %v463_v50  ;;  %v645_v54 = vmul.f32 %v463_v50, %v463_v50  ;;  %592 = vst [vmem:[%s1450_s20 + $0xa8] sm:$0xff] %v1485_v51 }
 0x159   : > { %v608_v56 = vadd.f32 %v950_v40, %v607_v53  ;;  %v676_v57 = vadd.f32 %v675_v52, %v645_v54 }
 0x15b   : > { %v677_v59 = vadd.f32 %v676_v57, %v646_v55  ;;  %v954_v60 = vpop.f32.mrb[8].mxu0  ;;  %v609_v61 = vadd.f32 %v951_v48, %v608_v56  ;;  %v1490_v62 = vpop.f32.mrb[8].mxu1 }
 0x15c   : > { %581 = vst [vmem:[%s1450_s20 + $0x50] sm:$0xff] %v954_v60  ;;  %v476_v63 = vpop.f32.mrb[9].mxu0  ;;  %597 = vst [vmem:[%s1450_s20 + $0xd0] sm:$0xff] %v1490_v62  ;;  %v1495_v0 = vpop.f32.mrb[9].mxu1  ;;  %v650_v11 = vmul.f32 %v954_v60, %v954_v60 }
 0x15d   : > { %579 = vst [vmem:[%s1450_s20 + $0x40] sm:$0xff] %v476_v63  ;;  %v610_v1 = vadd.f32 %v609_v61, %v476_v63  ;;  %v648_v2 = vmul.f32 %v476_v63, %v476_v63  ;;  %v678_v3 = vadd.f32 %v677_v59, %v647_v58  ;;  %v955_v4 = vpop.f32.mrb[10].mxu0  ;;  %595 = vst [vmem:[%s1450_s20 + $0xc0] sm:$0xff] %v1495_v0  ;;  %v1500_v5 = vpop.f32.mrb[10].mxu1 }
 0x15e   : > { %582 = vst [vmem:[%s1450_s20 + $0x58] sm:$0xff] %v955_v4  ;;  %v479_v6 = vpop.f32.mrb[11].mxu0  ;;  %598 = vst [vmem:[%s1450_s20 + $0xd8] sm:$0xff] %v1500_v5  ;;  %v1505_v7 = vpop.f32.mrb[11].mxu1  ;;  %v651_v14 = vmul.f32 %v955_v4, %v955_v4 }
 0x15f   : > { %v679_v8 = vadd.f32 %v678_v3, %v648_v2  ;;  %580 = vst [vmem:[%s1450_s20 + $0x48] sm:$0xff] %v479_v6  ;;  %v611_v9 = vadd.f32 %v610_v1, %v479_v6  ;;  %v649_v10 = vmul.f32 %v479_v6, %v479_v6  ;;  %596 = vst [vmem:[%s1450_s20 + $0xc8] sm:$0xff] %v1505_v7 }
 0x161   : > { %v612_v12 = vadd.f32 %v954_v60, %v611_v9  ;;  %v680_v13 = vadd.f32 %v679_v8, %v649_v10 }
 0x163   : > { %v681_v15 = vadd.f32 %v680_v13, %v650_v11  ;;  %v958_v16 = vpop.f32.mrb[12].mxu0  ;;  %v613_v17 = vadd.f32 %v955_v4, %v612_v12  ;;  %v1512_v18 = vpop.f32.mrb[12].mxu1 }
 0x164   : > { %585 = vst [vmem:[%s1450_s20 + $0x70] sm:$0xff] %v958_v16  ;;  %v492_v19 = vpop.f32.mrb[13].mxu0  ;;  %601 = vst [vmem:[%s1450_s20 + $0xf0] sm:$0xff] %v1512_v18  ;;  %v1517_v20 = vpop.f32.mrb[13].mxu1 }
 0x165   : > { %583 = vst [vmem:[%s1450_s20 + $0x60] sm:$0xff] %v492_v19  ;;  %v614_v21 = vadd.f32 %v613_v17, %v492_v19  ;;  %v652_v22 = vmul.f32 %v492_v19, %v492_v19  ;;  %v682_v23 = vadd.f32 %v681_v15, %v651_v14  ;;  %v959_v24 = vpop.f32.mrb[14].mxu0  ;;  %599 = vst [vmem:[%s1450_s20 + $0xe0] sm:$0xff] %v1517_v20  ;;  %v1529_v26 = vpop.f32.mrb[14].mxu1 }
 0x166   : > { %586 = vst [vmem:[%s1450_s20 + $0x78] sm:$0xff] %v959_v24  ;;  %v495_v28 = vpop.f32.mrb[15].mxu0  ;;  %602 = vst [vmem:[%s1450_s20 + $0xf8] sm:$0xff] %v1529_v26  ;;  %v1534_v30 = vpop.f32.mrb[15].mxu1 }
 0x167   : > { %v683_v32 = vadd.f32 %v682_v23, %v652_v22  ;;  %584 = vst [vmem:[%s1450_s20 + $0x68] sm:$0xff] %v495_v28  ;;  %v615_v33 = vadd.f32 %v614_v21, %v495_v28  ;;  %v653_v34 = vmul.f32 %v495_v28, %v495_v28  ;;  %600 = vst [vmem:[%s1450_s20 + $0xe8] sm:$0xff] %v1534_v30 }
 0x168   : > { %1153 = shalt.err (!%p1150_p7)
}
 0x169   : > { %s1154_s30 = scalar_lea.hbm %s1522_s26, 4096  ;;  %s1158_s10 = scalar_lea.hbm %s1662_s2, 8192 }
 0x16a   : > { %p1155_p9 = scmp.ne.s32.totalorder %s1522_s26, %s1154_s30  ;;  %p1159_p5 = scmp.lt.u32.totalorder %s1522_s26, %s1662_s2 }
 0x16b   : > { %p1160_p11 = scmp.lt.u32.totalorder %s1158_s10, %s1154_s30  ;;  %p1162_p4 = scmp.lt.u32.totalorder %s1154_s30, %s1522_s26 }
 0x16c   : > { %p1156_p1 = pnand %p1155_p9, %p1366_p12 }
 0x16d   : > { %p1161_p2 = por %p1160_p11, %p1159_p5 }
 0x16e   : > { %p1157_p0 = pneg %p1156_p1 }
 0x16f   : > { %p1163_p6 = por %p1162_p4, %p1161_p2 }
 0x171   : > { %p1164_p8 = pnand %p1163_p6, %p1157_p0 }
 0x173   : > { %1167 = shalt.err (!%p1164_p8)
}
 0x174   : > { %s1249_s20 = smov 128   ;;  %s1250_s8 = smov 8   ;;  %v654_v35 = vmul.f32 %v958_v16, %v958_v16  ;;  %v616_v36 = vadd.f32 %v958_v16, %v615_v33  ;;  %v684_v37 = vadd.f32 %v683_v32, %v653_v34  ;;  %v655_v38 = vmul.f32 %v959_v24, %v959_v24 }
 0x175   : > { %998 = dma.vmem_to_hbm [thread:$0]  (%p1366_p12), %s1524_s9, 4096, %s1522_s26, %s713_s5, %s1249_s20, %s1249_s20, %s1250_s8   ;;  %v656_v41 = vmul.f32 %v1455_v27, %v1455_v27  ;;  %v657_v48 = vmul.f32 %v1465_v31, %v1465_v31  ;;  %v658_v50 = vmul.f32 %v1448_v25, %v1448_v25  ;;  %v659_v54 = vmul.f32 %v1460_v29, %v1460_v29 }
 0x176   : > { %v685_v39 = vadd.f32 %v684_v37, %v654_v35  ;;  %v617_v40 = vadd.f32 %v959_v24, %v616_v36  ;;  %v661_v60 = vmul.f32 %v1485_v51, %v1485_v51  ;;  %v665_v8 = vmul.f32 %v1505_v7, %v1505_v7  ;;  %s870_s9 = sshll.u32 %s1417_s6, 1  ;;  %s899_s4 = sshll.u32 %s1293_s16, 5 }
 0x177   : > { %v670_v16 = vmul.f32 %v1512_v18, %v1512_v18  ;;  %s214_s25 = scalar_lea.vmem [#allocation8], %s870_s9  ;;  %vm709_vm0 = vcmask 1040384   ;;  %s1616_s28 = scalar_lea.hbm %s1663_s3, %s899_s4 }
 0x178   : > { %v618_v43 = vadd.f32 %v617_v40, %v1455_v27  ;;  %v686_v45 = vadd.f32 %v685_v39, %v655_v38  ;;  %v660_v27 = vmul.f32 %v1475_v44, %v1475_v44  ;;  %s747_s26 = sshll.u32 %s214_s25, 4  ;;  %s718_s23 = scalar_lea.sflag [#allocation9], %s1417_s6  ;;  %s1618_s26 = int_to_ptr.vmem [resolvable:$true] %s747_s26 }
 0x179   : > { %s1168_s29 = scalar_lea.vmem %s1618_s26, 32  ;;  %s1251_s16 = smov [#allocation8]  }
 0x17a   : > { %v687_v46 = vadd.f32 %v686_v45, %v656_v41  ;;  %v619_v47 = vadd.f32 %v618_v43, %v1465_v31  ;;  %p1169_p10 = scmp.ne.s32.totalorder %s1618_s26, %s1168_s29  ;;  %s1172_s30 = sshll.u32 %s1251_s16, 4  ;;  %s1173_s30 = int_to_ptr.vmem [resolvable:$false] %s1172_s30 }
 0x17b   : > { %s1174_s22 = scalar_lea.vmem %s1173_s30, 64  ;;  %p1175_p7 = scmp.lt.s32.totalorder %s1618_s26, %s1173_s30 }
 0x17c   : > { %v620_v52 = vadd.f32 %v1448_v25, %v619_v47  ;;  %v688_v53 = vadd.f32 %v687_v46, %v657_v48  ;;  %v662_v25 = vmul.f32 %v1470_v42, %v1470_v42  ;;  %p1170_p13 = pnand %p1169_p10, %p1366_p12  ;;  %p1176_p9 = scmp.lt.s32.totalorder %s1174_s22, %s1168_s29 }
 0x17e   : > { %v689_v55 = vadd.f32 %v688_v53, %v658_v50  ;;  %v621_v56 = vadd.f32 %v1460_v29, %v620_v52  ;;  %v663_v29 = vmul.f32 %v1480_v49, %v1480_v49  ;;  %p1171_p3 = pneg %p1170_p13  ;;  %p1177_p1 = por %p1176_p9, %p1175_p7 }
 0x180   : > { %v622_v57 = vadd.f32 %v621_v56, %v1475_v44  ;;  %v690_v58 = vadd.f32 %v689_v55, %v659_v54  ;;  %v664_v44 = vmul.f32 %v1495_v0, %v1495_v0  ;;  %p1178_p0 = pnand %p1177_p1, %p1171_p3 }
 0x182   : > { %v691_v59 = vadd.f32 %v690_v58, %v660_v27  ;;  %v623_v31 = vadd.f32 %v622_v57, %v1485_v51 }
 0x184   : > { %v624_v61 = vadd.f32 %v1470_v42, %v623_v31  ;;  %v692_v63 = vadd.f32 %v691_v59, %v661_v60  ;;  %v666_v42 = vmul.f32 %v1490_v62, %v1490_v62 }
 0x186   : > { %v693_v1 = vadd.f32 %v692_v63, %v662_v25  ;;  %v625_v2 = vadd.f32 %v1480_v49, %v624_v61  ;;  %v667_v49 = vmul.f32 %v1500_v5, %v1500_v5 }
 0x188   : > { %v626_v3 = vadd.f32 %v625_v2, %v1495_v0  ;;  %v694_v4 = vadd.f32 %v693_v1, %v663_v29  ;;  %v668_v0 = vmul.f32 %v1517_v20, %v1517_v20 }
 0x18a   : > { %v695_v6 = vadd.f32 %v694_v4, %v664_v44  ;;  %v627_v51 = vadd.f32 %v626_v3, %v1505_v7 }
 0x18c   : > { %v628_v9 = vadd.f32 %v1490_v62, %v627_v51  ;;  %v696_v10 = vadd.f32 %v695_v6, %v665_v8  ;;  %v669_v62 = vmul.f32 %v1534_v30, %v1534_v30 }
 0x18e   : > { %v697_v11 = vadd.f32 %v696_v10, %v666_v42  ;;  %v629_v12 = vadd.f32 %v1500_v5, %v628_v9  ;;  %v671_v5 = vmul.f32 %v1529_v26, %v1529_v26 }
 0x190   : > { %v630_v13 = vadd.f32 %v629_v12, %v1517_v20  ;;  %v698_v14 = vadd.f32 %v697_v11, %v667_v49 }
 0x192   : > { %v699_v7 = vadd.f32 %v698_v14, %v668_v0  ;;  %v631_v15 = vadd.f32 %v630_v13, %v1534_v30 }
 0x194   : > { %v632_v17 = vadd.f32 %v1512_v18, %v631_v15  ;;  %v700_v19 = vadd.f32 %v699_v7, %v669_v62 }
 0x196   : > { %v633_v20 = vadd.f32 %v1529_v26, %v632_v17  ;;  %v701_v21 = vadd.f32 %v700_v19, %v670_v16 }
 0x198   : > { %v634_v22 = vrot.slane %v633_v20, 4  ;;  %v702_v23 = vadd.f32 %v701_v21, %v671_v5 }
 0x19a   : > { %v635_v24 = vadd.f32 %v634_v22, %v633_v20  ;;  %v703_v28 = vrot.slane %v702_v23, 4 }
 0x19c   : > { %v636_v32 = vrot.slane %v635_v24, 2  ;;  %v704_v33 = vadd.f32 %v703_v28, %v702_v23 }
 0x19e   : > { %v637_v30 = vadd.f32 %v636_v32, %v635_v24  ;;  %v705_v34 = vrot.slane %v704_v33, 2 }
 0x1a0   : > { %v638_v35 = vrot.slane %v637_v30, 1  ;;  %v706_v18 = vadd.f32 %v705_v34, %v704_v33 }
 0x1a2   : > { %v707_v36 = vrot.slane %v706_v18, 1  ;;  %v639_v26 = vadd.f32 %v638_v35, %v637_v30 }
 0x1a4   : > { %v708_v37 = vadd.f32 %v707_v36, %v706_v18 }
 0x1a6   : > { %v710_v38 = vsel %vm709_vm0, %v639_v26, %v708_v37 }
 0x1a7   : > { %711 = vst [vmem:[%s214_s25] sm:$0x3] %v710_v38 }
 0x1a8   : > { %1181 = shalt.err (!%p1178_p0)
}
 0x1a9   : > { %s1182_s6 = scalar_lea.hbm %s1616_s28, 32  ;;  %s1186_s11 = scalar_lea.hbm %s1663_s3, 64 }
 0x1aa   : > { %p1183_p5 = scmp.ne.s32.totalorder %s1616_s28, %s1182_s6  ;;  %p1187_p4 = scmp.lt.u32.totalorder %s1616_s28, %s1663_s3 }
 0x1ab   : > { %p1188_p6 = scmp.lt.u32.totalorder %s1186_s11, %s1182_s6  ;;  %p1190_p10 = scmp.lt.u32.totalorder %s1182_s6, %s1616_s28 }
 0x1ac   : > { %p1184_p11 = pnand %p1183_p5, %p1366_p12 }
 0x1ad   : > { %p1189_p8 = por %p1188_p6, %p1187_p4 }
 0x1ae   : > { %p1185_p2 = pneg %p1184_p11 }
 0x1af   : > { %p1191_p13 = por %p1190_p10, %p1189_p8 }
 0x1b1   : > { %p1192_p3 = pnand %p1191_p13, %p1185_p2 }
 0x1b3   : > { %1195 = shalt.err (!%p1192_p3)
}
 0x1b4   : > { %999 = dma.vmem_to_hbm [thread:$0]  (%p1366_p12), %s1618_s26, 32, %s1616_s28, %s718_s23  }
 0x1b5 PF: > { %s759_s8 = sand.u32 1, %s1230_s12   ;;  %p1678_p7 = scmp.ne.s32.totalorder %s1668_s19, 0 }
 0x1b6   : > { %p1679_p9 = scmp.ge.s32.totalorder %s1242_s15, 2  ;;  %s760_s9 = scalar_lea.sflag [#allocation4], %s759_s8 }
 0x1b8   : > { %p1011_p1 = pnand %p1679_p9, %p1678_p7 }
 0x1ba   : > { %1221 = dma.done.wait (!%p1011_p1), %s760_s9, 4096  }
 0x1bb   : > { %1223 = vsyncadd (!%p1011_p1), %s760_s9, 4294963200  ;;  %s769_s4 = scalar_lea.sflag [#allocation9], %s759_s8 }
 0x1bc   : > { %1225 = dma.done.wait (!%p1011_p1), %s769_s4, 32  }
 0x1bd   : > { %1227 = vsyncadd (!%p1011_p1), %s769_s4, 4294967264  ;;  %p21_p12 = scmp.ge.s32.totalorder %s1328_s24, 4   ;;  %s1680_s12 = smov %s1234_s13 }
 0x1be   : > { %s1681_s13 = smov %s1238_s14  ;;  %s1682_s14 = smov %s1362_s17 }
 0x1bf   : > { %s1683_s15 = smov %s1328_s24  ;;  %23 = sbr.rel (!%p21_p12) target bundleno = 8 (0x8), region = 94 }
 0x1c6   :  { %774 = vsyncpa [#allocation3], 1 }
 0x1c7   :  { %776 = vsyncpa [#allocation3 + $0x1], 1 }
 0x1c8   :  { %777 = vsyncpa [#allocation6], 1 }
 0x1c9   :  { %778 = vsyncpa [#allocation4], 1 }
 0x1ca   :  { %780 = vsyncpa [#allocation4 + $0x1], 1 }
 0x1cb   :  { %781 = vsyncpa [#allocation9], 1 }
 0x1cc   :  { %783 = vsyncpa [#allocation9 + $0x1], 1 }

</bundles_post_ra>
